<compile_context>
chip_gen: v6e
topology: v6e:2x2x1
jax: 0.10.0
libtpu: 0.0.40
codegen_flags: <defaults>
</compile_context>

<pallas_src>
import functools

import jax
import jax.numpy as jnp
from jax.experimental import pallas as pl
from jax.experimental.pallas import tpu as pltpu


def _lstm_kernel(x_ref, wih_ref, whh_ref, b_ref, hT_ref, *,
                 seq_len, batch, hidden_dim):
    H = hidden_dim
    B = batch

    # Hoisted loads: weights / bias are read exactly once.
    whh = whh_ref[...]                        # (H, 4H)
    bias = b_ref[...]                         # (1, 4H)

    # Prologue: input projection for ALL timesteps in one well-shaped MXU
    # matmul, (T*B, D) x (D, 4H) -> (T*B, 4H), with the fused bias added once.
    xw = jnp.dot(x_ref[...], wih_ref[...],
                 preferred_element_type=jnp.float32) + bias

    h = jnp.zeros((B, H), jnp.float32)
    c = jnp.zeros((B, H), jnp.float32)

    # Recurrence fully unrolled inside the single kernel invocation (T is
    # small and static). Per step only the (B,H)x(H,4H) recurrent matmul and
    # the gate elementwise math remain on the serial path.
    for t in range(seq_len):
        gates = xw[t * B:(t + 1) * B, :] + jnp.dot(
            h, whh, preferred_element_type=jnp.float32)       # (B, 4H)

        # Gate order matches torch.nn.LSTM: i, f, g, o. With H=32 the slices
        # land on 32-lane boundaries of a single (*,128) vreg.
        i_g = jax.nn.sigmoid(gates[:, 0 * H:1 * H])
        f_g = jax.nn.sigmoid(gates[:, 1 * H:2 * H])
        g_g = jnp.tanh(gates[:, 2 * H:3 * H])
        o_g = jax.nn.sigmoid(gates[:, 3 * H:4 * H])

        c = f_g * c + i_g * g_g
        h = o_g * jnp.tanh(c)

    hT_ref[...] = h


def lstm_model_forward(x, w_ih, w_hh, b_ih, b_hh, w_fc, b_fc):
    """x: (B, T, D) float32. Returns (B, 1) float32 (== LSTMModel.forward)."""
    B, T, D = x.shape
    H = w_hh.shape[1]                       # w_hh is (4H, H) in torch convention
    assert w_ih.shape == (4 * H, D)

    # Pad batch to a full sublane group (multiple of 8); padded rows carry
    # bounded junk that is dropped at the end and never affects real rows.
    Bp = ((B + 7) // 8) * 8

    # Pre-transpose params so the kernel does plain row-major matmuls.
    wih_t = jnp.transpose(w_ih)                 # (D, 4H)
    whh_t = jnp.transpose(w_hh)                 # (H, 4H)
    bias = (b_ih + b_hh).reshape(1, 4 * H)      # (1, 4H)

    # Time-major, batch-padded, flattened for the one-shot input projection.
    x_tbd = jnp.transpose(x, (1, 0, 2))         # (T, B, D)
    if Bp != B:
        x_tbd = jnp.pad(x_tbd, ((0, 0), (0, Bp - B), (0, 0)))
    x2d = x_tbd.reshape(T * Bp, D)              # (T*Bp, D)

    kernel = functools.partial(_lstm_kernel, seq_len=T, batch=Bp, hidden_dim=H)

    # Single invocation; all operands fit trivially in VMEM at these sizes.
    # TODO(synk): for production sizes (large H), single-buffer the constant
    # weights (pl.Buffered(1)) and add a batch-parallel grid axis for v7x.
    h_T = pl.pallas_call(
        kernel,
        out_shape=jax.ShapeDtypeStruct((Bp, H), jnp.float32),
        grid=(1,),
        in_specs=[
            pl.BlockSpec((T * Bp, D), lambda i: (0, 0)),     # x (time-major)
            pl.BlockSpec((D, 4 * H), lambda i: (0, 0)),      # W_ih^T
            pl.BlockSpec((H, 4 * H), lambda i: (0, 0)),      # W_hh^T
            pl.BlockSpec((1, 4 * H), lambda i: (0, 0)),      # b_ih + b_hh
        ],
        out_specs=pl.BlockSpec((Bp, H), lambda i: (0, 0)),   # h_T (lane-dense-ish)
        compiler_params=pltpu.CompilerParams(
            dimension_semantics=("arbitrary",)),
    )(x2d, wih_t, whh_t, bias)

    # Final Linear(hidden, 1) on the last hidden state, done in the wrapper so
    # the kernel never stores a lane-1 output.
    return h_T[:B] @ jnp.transpose(w_fc) + b_fc.reshape(1, 1)


def _reference_forward(x, w_ih, w_hh, b_ih, b_hh, w_fc, b_fc):
    """Pure-JAX reference with identical PyTorch LSTM semantics."""
    B, T, D = x.shape
    H = w_hh.shape[1]
    h = jnp.zeros((B, H), jnp.float32)
    c = jnp.zeros((B, H), jnp.float32)

    def step(carry, x_t):
        h, c = carry
        gates = x_t @ w_ih.T + h @ w_hh.T + b_ih + b_hh
        i = jax.nn.sigmoid(gates[:, 0 * H:1 * H])
        f = jax.nn.sigmoid(gates[:, 1 * H:2 * H])
        g = jnp.tanh(gates[:, 2 * H:3 * H])
        o = jax.nn.sigmoid(gates[:, 3 * H:4 * H])
        c = f * c + i * g
        h = o * jnp.tanh(c)
        return (h, c), None

    (h, c), _ = jax.lax.scan(step, (h, c), jnp.transpose(x, (1, 0, 2)))
    return h @ w_fc.T + b_fc


if __name__ == "__main__":
    B, T, D, H = 2, 8, 16, 32

    key = jax.random.PRNGKey(0)
    k = jax.random.split(key, 8)
    bound = 1.0 / jnp.sqrt(H)

    x = jax.random.normal(k[0], (B, T, D), jnp.float32)
    w_ih = jax.random.uniform(k[1], (4 * H, D), jnp.float32, -bound, bound)
    w_hh = jax.random.uniform(k[2], (4 * H, H), jnp.float32, -bound, bound)
    b_ih = jax.random.uniform(k[3], (4 * H,), jnp.float32, -bound, bound)
    b_hh = jax.random.uniform(k[4], (4 * H,), jnp.float32, -bound, bound)
    w_fc = jax.random.uniform(k[5], (1, H), jnp.float32, -bound, bound)
    b_fc = jax.random.uniform(k[6], (1,), jnp.float32, -bound, bound)

    out = lstm_model_forward(x, w_ih, w_hh, b_ih, b_hh, w_fc, b_fc)
    out = jax.block_until_ready(out)

    ref = _reference_forward(x, w_ih, w_hh, b_ih, b_hh, w_fc, b_fc)
    assert out.shape == (B, 1), out.shape
    assert jnp.allclose(out, ref, atol=1e-5, rtol=1e-5), (out, ref)

    print("KERNEL_OK")
</pallas_src>

<mosaic_0001>
module attributes {stable_mosaic.version = 11 : i64} {
  func.func @_lstm_kernel(%arg0: i32, %arg1: memref<64x16xf32, #tpu.memory_space<vmem>>, %arg2: memref<16x128xf32, #tpu.memory_space<vmem>>, %arg3: memref<32x128xf32, #tpu.memory_space<vmem>>, %arg4: memref<1x128xf32, #tpu.memory_space<vmem>>, %arg5: memref<8x32xf32, #tpu.memory_space<vmem>>) attributes {dimension_semantics = [#tpu.dimension_semantics<arbitrary>], iteration_bounds = array<i64: 1>, scalar_prefetch = 0 : i64, scratch_operands = 0 : i64, tpu.core_type = #tpu.core_type<tc>, window_params = [{pipeline_mode = #tpu.pipeline_mode<synchronous>, transform_indices = @transform_0, window_bounds = array<i64: 64, 16>}, {pipeline_mode = #tpu.pipeline_mode<synchronous>, transform_indices = @transform_1, window_bounds = array<i64: 16, 128>}, {pipeline_mode = #tpu.pipeline_mode<synchronous>, transform_indices = @transform_2, window_bounds = array<i64: 32, 128>}, {pipeline_mode = #tpu.pipeline_mode<synchronous>, transform_indices = @transform_3, window_bounds = array<i64: 1, 128>}, {pipeline_mode = #tpu.pipeline_mode<synchronous>, transform_indices = @transform_4, window_bounds = array<i64: 8, 32>}]} {
    %c0 = arith.constant 0 : index
    %c0_0 = arith.constant 0 : index
    %0 = vector.load %arg3[%c0, %c0_0] : memref<32x128xf32, #tpu.memory_space<vmem>>, vector<32x128xf32>
    %c0_1 = arith.constant 0 : index
    %c0_2 = arith.constant 0 : index
    %1 = vector.load %arg4[%c0_1, %c0_2] : memref<1x128xf32, #tpu.memory_space<vmem>>, vector<1x128xf32>
    %c0_3 = arith.constant 0 : index
    %c0_4 = arith.constant 0 : index
    %2 = vector.load %arg1[%c0_3, %c0_4] : memref<64x16xf32, #tpu.memory_space<vmem>>, vector<64x16xf32>
    %c0_5 = arith.constant 0 : index
    %c0_6 = arith.constant 0 : index
    %3 = vector.load %arg2[%c0_5, %c0_6] : memref<16x128xf32, #tpu.memory_space<vmem>>, vector<16x128xf32>
    %cst = arith.constant dense<0.000000e+00> : vector<64x128xf32>
    %4 = tpu.matmul %2, %3, %cst {dimension_numbers = #tpu.dot_dimension_numbers<[1], [0], [0], [1], [0, 0, 1, 1], [], []>} : vector<64x16xf32>, vector<16x128xf32>, vector<64x128xf32> -> vector<64x128xf32>
    %5 = vector.broadcast %1 : vector<1x128xf32> to vector<64x128xf32>
    %6 = arith.addf %4, %5 : vector<64x128xf32>
    %cst_7 = arith.constant 0.000000e+00 : f32
    %7 = vector.broadcast %cst_7 : f32 to vector<8x32xf32>
    %cst_8 = arith.constant 0.000000e+00 : f32
    %8 = vector.broadcast %cst_8 : f32 to vector<8x32xf32>
    %9 = vector.extract_strided_slice %6 {offsets = [0, 0], sizes = [8, 128], strides = [1, 1]} : vector<64x128xf32> to vector<8x128xf32>
    %cst_9 = arith.constant dense<0.000000e+00> : vector<8x128xf32>
    %10 = tpu.matmul %7, %0, %cst_9 {dimension_numbers = #tpu.dot_dimension_numbers<[1], [0], [0], [1], [0, 0, 1, 1], [], []>} : vector<8x32xf32>, vector<32x128xf32>, vector<8x128xf32> -> vector<8x128xf32>
    %11 = arith.addf %9, %10 : vector<8x128xf32>
    %12 = vector.extract_strided_slice %11 {offsets = [0, 0], sizes = [8, 32], strides = [1, 1]} : vector<8x128xf32> to vector<8x32xf32>
    %13 = arith.negf %12 : vector<8x32xf32>
    %14 = math.exp %13 : vector<8x32xf32>
    %cst_10 = arith.constant 1.000000e+00 : f32
    %15 = vector.broadcast %cst_10 : f32 to vector<8x32xf32>
    %16 = arith.addf %15, %14 : vector<8x32xf32>
    %17 = arith.divf %15, %16 : vector<8x32xf32>
    %18 = vector.extract_strided_slice %11 {offsets = [0, 32], sizes = [8, 32], strides = [1, 1]} : vector<8x128xf32> to vector<8x32xf32>
    %19 = arith.negf %18 : vector<8x32xf32>
    %20 = math.exp %19 : vector<8x32xf32>
    %cst_11 = arith.constant 1.000000e+00 : f32
    %21 = vector.broadcast %cst_11 : f32 to vector<8x32xf32>
    %22 = arith.addf %21, %20 : vector<8x32xf32>
    %23 = arith.divf %21, %22 : vector<8x32xf32>
    %24 = vector.extract_strided_slice %11 {offsets = [0, 64], sizes = [8, 32], strides = [1, 1]} : vector<8x128xf32> to vector<8x32xf32>
    %25 = math.tanh %24 : vector<8x32xf32>
    %26 = vector.extract_strided_slice %11 {offsets = [0, 96], sizes = [8, 32], strides = [1, 1]} : vector<8x128xf32> to vector<8x32xf32>
    %27 = arith.negf %26 : vector<8x32xf32>
    %28 = math.exp %27 : vector<8x32xf32>
    %cst_12 = arith.constant 1.000000e+00 : f32
    %29 = vector.broadcast %cst_12 : f32 to vector<8x32xf32>
    %30 = arith.addf %29, %28 : vector<8x32xf32>
    %31 = arith.divf %29, %30 : vector<8x32xf32>
    %32 = arith.mulf %23, %8 : vector<8x32xf32>
    %33 = arith.mulf %17, %25 : vector<8x32xf32>
    %34 = arith.addf %32, %33 : vector<8x32xf32>
    %35 = math.tanh %34 : vector<8x32xf32>
    %36 = arith.mulf %31, %35 : vector<8x32xf32>
    %37 = vector.extract_strided_slice %6 {offsets = [8, 0], sizes = [8, 128], strides = [1, 1]} : vector<64x128xf32> to vector<8x128xf32>
    %cst_13 = arith.constant dense<0.000000e+00> : vector<8x128xf32>
    %38 = tpu.matmul %36, %0, %cst_13 {dimension_numbers = #tpu.dot_dimension_numbers<[1], [0], [0], [1], [0, 0, 1, 1], [], []>} : vector<8x32xf32>, vector<32x128xf32>, vector<8x128xf32> -> vector<8x128xf32>
    %39 = arith.addf %37, %38 : vector<8x128xf32>
    %40 = vector.extract_strided_slice %39 {offsets = [0, 0], sizes = [8, 32], strides = [1, 1]} : vector<8x128xf32> to vector<8x32xf32>
    %41 = arith.negf %40 : vector<8x32xf32>
    %42 = math.exp %41 : vector<8x32xf32>
    %cst_14 = arith.constant 1.000000e+00 : f32
    %43 = vector.broadcast %cst_14 : f32 to vector<8x32xf32>
    %44 = arith.addf %43, %42 : vector<8x32xf32>
    %45 = arith.divf %43, %44 : vector<8x32xf32>
    %46 = vector.extract_strided_slice %39 {offsets = [0, 32], sizes = [8, 32], strides = [1, 1]} : vector<8x128xf32> to vector<8x32xf32>
    %47 = arith.negf %46 : vector<8x32xf32>
    %48 = math.exp %47 : vector<8x32xf32>
    %cst_15 = arith.constant 1.000000e+00 : f32
    %49 = vector.broadcast %cst_15 : f32 to vector<8x32xf32>
    %50 = arith.addf %49, %48 : vector<8x32xf32>
    %51 = arith.divf %49, %50 : vector<8x32xf32>
    %52 = vector.extract_strided_slice %39 {offsets = [0, 64], sizes = [8, 32], strides = [1, 1]} : vector<8x128xf32> to vector<8x32xf32>
    %53 = math.tanh %52 : vector<8x32xf32>
    %54 = vector.extract_strided_slice %39 {offsets = [0, 96], sizes = [8, 32], strides = [1, 1]} : vector<8x128xf32> to vector<8x32xf32>
    %55 = arith.negf %54 : vector<8x32xf32>
    %56 = math.exp %55 : vector<8x32xf32>
    %cst_16 = arith.constant 1.000000e+00 : f32
    %57 = vector.broadcast %cst_16 : f32 to vector<8x32xf32>
    %58 = arith.addf %57, %56 : vector<8x32xf32>
    %59 = arith.divf %57, %58 : vector<8x32xf32>
    %60 = arith.mulf %51, %34 : vector<8x32xf32>
    %61 = arith.mulf %45, %53 : vector<8x32xf32>
    %62 = arith.addf %60, %61 : vector<8x32xf32>
    %63 = math.tanh %62 : vector<8x32xf32>
    %64 = arith.mulf %59, %63 : vector<8x32xf32>
    %65 = vector.extract_strided_slice %6 {offsets = [16, 0], sizes = [8, 128], strides = [1, 1]} : vector<64x128xf32> to vector<8x128xf32>
    %cst_17 = arith.constant dense<0.000000e+00> : vector<8x128xf32>
    %66 = tpu.matmul %64, %0, %cst_17 {dimension_numbers = #tpu.dot_dimension_numbers<[1], [0], [0], [1], [0, 0, 1, 1], [], []>} : vector<8x32xf32>, vector<32x128xf32>, vector<8x128xf32> -> vector<8x128xf32>
    %67 = arith.addf %65, %66 : vector<8x128xf32>
    %68 = vector.extract_strided_slice %67 {offsets = [0, 0], sizes = [8, 32], strides = [1, 1]} : vector<8x128xf32> to vector<8x32xf32>
    %69 = arith.negf %68 : vector<8x32xf32>
    %70 = math.exp %69 : vector<8x32xf32>
    %cst_18 = arith.constant 1.000000e+00 : f32
    %71 = vector.broadcast %cst_18 : f32 to vector<8x32xf32>
    %72 = arith.addf %71, %70 : vector<8x32xf32>
    %73 = arith.divf %71, %72 : vector<8x32xf32>
    %74 = vector.extract_strided_slice %67 {offsets = [0, 32], sizes = [8, 32], strides = [1, 1]} : vector<8x128xf32> to vector<8x32xf32>
    %75 = arith.negf %74 : vector<8x32xf32>
    %76 = math.exp %75 : vector<8x32xf32>
    %cst_19 = arith.constant 1.000000e+00 : f32
    %77 = vector.broadcast %cst_19 : f32 to vector<8x32xf32>
    %78 = arith.addf %77, %76 : vector<8x32xf32>
    %79 = arith.divf %77, %78 : vector<8x32xf32>
    %80 = vector.extract_strided_slice %67 {offsets = [0, 64], sizes = [8, 32], strides = [1, 1]} : vector<8x128xf32> to vector<8x32xf32>
    %81 = math.tanh %80 : vector<8x32xf32>
    %82 = vector.extract_strided_slice %67 {offsets = [0, 96], sizes = [8, 32], strides = [1, 1]} : vector<8x128xf32> to vector<8x32xf32>
    %83 = arith.negf %82 : vector<8x32xf32>
    %84 = math.exp %83 : vector<8x32xf32>
    %cst_20 = arith.constant 1.000000e+00 : f32
    %85 = vector.broadcast %cst_20 : f32 to vector<8x32xf32>
    %86 = arith.addf %85, %84 : vector<8x32xf32>
    %87 = arith.divf %85, %86 : vector<8x32xf32>
    %88 = arith.mulf %79, %62 : vector<8x32xf32>
    %89 = arith.mulf %73, %81 : vector<8x32xf32>
    %90 = arith.addf %88, %89 : vector<8x32xf32>
    %91 = math.tanh %90 : vector<8x32xf32>
    %92 = arith.mulf %87, %91 : vector<8x32xf32>
    %93 = vector.extract_strided_slice %6 {offsets = [24, 0], sizes = [8, 128], strides = [1, 1]} : vector<64x128xf32> to vector<8x128xf32>
    %cst_21 = arith.constant dense<0.000000e+00> : vector<8x128xf32>
    %94 = tpu.matmul %92, %0, %cst_21 {dimension_numbers = #tpu.dot_dimension_numbers<[1], [0], [0], [1], [0, 0, 1, 1], [], []>} : vector<8x32xf32>, vector<32x128xf32>, vector<8x128xf32> -> vector<8x128xf32>
    %95 = arith.addf %93, %94 : vector<8x128xf32>
    %96 = vector.extract_strided_slice %95 {offsets = [0, 0], sizes = [8, 32], strides = [1, 1]} : vector<8x128xf32> to vector<8x32xf32>
    %97 = arith.negf %96 : vector<8x32xf32>
    %98 = math.exp %97 : vector<8x32xf32>
    %cst_22 = arith.constant 1.000000e+00 : f32
    %99 = vector.broadcast %cst_22 : f32 to vector<8x32xf32>
    %100 = arith.addf %99, %98 : vector<8x32xf32>
    %101 = arith.divf %99, %100 : vector<8x32xf32>
    %102 = vector.extract_strided_slice %95 {offsets = [0, 32], sizes = [8, 32], strides = [1, 1]} : vector<8x128xf32> to vector<8x32xf32>
    %103 = arith.negf %102 : vector<8x32xf32>
    %104 = math.exp %103 : vector<8x32xf32>
    %cst_23 = arith.constant 1.000000e+00 : f32
    %105 = vector.broadcast %cst_23 : f32 to vector<8x32xf32>
    %106 = arith.addf %105, %104 : vector<8x32xf32>
    %107 = arith.divf %105, %106 : vector<8x32xf32>
    %108 = vector.extract_strided_slice %95 {offsets = [0, 64], sizes = [8, 32], strides = [1, 1]} : vector<8x128xf32> to vector<8x32xf32>
    %109 = math.tanh %108 : vector<8x32xf32>
    %110 = vector.extract_strided_slice %95 {offsets = [0, 96], sizes = [8, 32], strides = [1, 1]} : vector<8x128xf32> to vector<8x32xf32>
    %111 = arith.negf %110 : vector<8x32xf32>
    %112 = math.exp %111 : vector<8x32xf32>
    %cst_24 = arith.constant 1.000000e+00 : f32
    %113 = vector.broadcast %cst_24 : f32 to vector<8x32xf32>
    %114 = arith.addf %113, %112 : vector<8x32xf32>
    %115 = arith.divf %113, %114 : vector<8x32xf32>
    %116 = arith.mulf %107, %90 : vector<8x32xf32>
    %117 = arith.mulf %101, %109 : vector<8x32xf32>
    %118 = arith.addf %116, %117 : vector<8x32xf32>
    %119 = math.tanh %118 : vector<8x32xf32>
    %120 = arith.mulf %115, %119 : vector<8x32xf32>
    %121 = vector.extract_strided_slice %6 {offsets = [32, 0], sizes = [8, 128], strides = [1, 1]} : vector<64x128xf32> to vector<8x128xf32>
    %cst_25 = arith.constant dense<0.000000e+00> : vector<8x128xf32>
    %122 = tpu.matmul %120, %0, %cst_25 {dimension_numbers = #tpu.dot_dimension_numbers<[1], [0], [0], [1], [0, 0, 1, 1], [], []>} : vector<8x32xf32>, vector<32x128xf32>, vector<8x128xf32> -> vector<8x128xf32>
    %123 = arith.addf %121, %122 : vector<8x128xf32>
    %124 = vector.extract_strided_slice %123 {offsets = [0, 0], sizes = [8, 32], strides = [1, 1]} : vector<8x128xf32> to vector<8x32xf32>
    %125 = arith.negf %124 : vector<8x32xf32>
    %126 = math.exp %125 : vector<8x32xf32>
    %cst_26 = arith.constant 1.000000e+00 : f32
    %127 = vector.broadcast %cst_26 : f32 to vector<8x32xf32>
    %128 = arith.addf %127, %126 : vector<8x32xf32>
    %129 = arith.divf %127, %128 : vector<8x32xf32>
    %130 = vector.extract_strided_slice %123 {offsets = [0, 32], sizes = [8, 32], strides = [1, 1]} : vector<8x128xf32> to vector<8x32xf32>
    %131 = arith.negf %130 : vector<8x32xf32>
    %132 = math.exp %131 : vector<8x32xf32>
    %cst_27 = arith.constant 1.000000e+00 : f32
    %133 = vector.broadcast %cst_27 : f32 to vector<8x32xf32>
    %134 = arith.addf %133, %132 : vector<8x32xf32>
    %135 = arith.divf %133, %134 : vector<8x32xf32>
    %136 = vector.extract_strided_slice %123 {offsets = [0, 64], sizes = [8, 32], strides = [1, 1]} : vector<8x128xf32> to vector<8x32xf32>
    %137 = math.tanh %136 : vector<8x32xf32>
    %138 = vector.extract_strided_slice %123 {offsets = [0, 96], sizes = [8, 32], strides = [1, 1]} : vector<8x128xf32> to vector<8x32xf32>
    %139 = arith.negf %138 : vector<8x32xf32>
    %140 = math.exp %139 : vector<8x32xf32>
    %cst_28 = arith.constant 1.000000e+00 : f32
    %141 = vector.broadcast %cst_28 : f32 to vector<8x32xf32>
    %142 = arith.addf %141, %140 : vector<8x32xf32>
    %143 = arith.divf %141, %142 : vector<8x32xf32>
    %144 = arith.mulf %135, %118 : vector<8x32xf32>
    %145 = arith.mulf %129, %137 : vector<8x32xf32>
    %146 = arith.addf %144, %145 : vector<8x32xf32>
    %147 = math.tanh %146 : vector<8x32xf32>
    %148 = arith.mulf %143, %147 : vector<8x32xf32>
    %149 = vector.extract_strided_slice %6 {offsets = [40, 0], sizes = [8, 128], strides = [1, 1]} : vector<64x128xf32> to vector<8x128xf32>
    %cst_29 = arith.constant dense<0.000000e+00> : vector<8x128xf32>
    %150 = tpu.matmul %148, %0, %cst_29 {dimension_numbers = #tpu.dot_dimension_numbers<[1], [0], [0], [1], [0, 0, 1, 1], [], []>} : vector<8x32xf32>, vector<32x128xf32>, vector<8x128xf32> -> vector<8x128xf32>
    %151 = arith.addf %149, %150 : vector<8x128xf32>
    %152 = vector.extract_strided_slice %151 {offsets = [0, 0], sizes = [8, 32], strides = [1, 1]} : vector<8x128xf32> to vector<8x32xf32>
    %153 = arith.negf %152 : vector<8x32xf32>
    %154 = math.exp %153 : vector<8x32xf32>
    %cst_30 = arith.constant 1.000000e+00 : f32
    %155 = vector.broadcast %cst_30 : f32 to vector<8x32xf32>
    %156 = arith.addf %155, %154 : vector<8x32xf32>
    %157 = arith.divf %155, %156 : vector<8x32xf32>
    %158 = vector.extract_strided_slice %151 {offsets = [0, 32], sizes = [8, 32], strides = [1, 1]} : vector<8x128xf32> to vector<8x32xf32>
    %159 = arith.negf %158 : vector<8x32xf32>
    %160 = math.exp %159 : vector<8x32xf32>
    %cst_31 = arith.constant 1.000000e+00 : f32
    %161 = vector.broadcast %cst_31 : f32 to vector<8x32xf32>
    %162 = arith.addf %161, %160 : vector<8x32xf32>
    %163 = arith.divf %161, %162 : vector<8x32xf32>
    %164 = vector.extract_strided_slice %151 {offsets = [0, 64], sizes = [8, 32], strides = [1, 1]} : vector<8x128xf32> to vector<8x32xf32>
    %165 = math.tanh %164 : vector<8x32xf32>
    %166 = vector.extract_strided_slice %151 {offsets = [0, 96], sizes = [8, 32], strides = [1, 1]} : vector<8x128xf32> to vector<8x32xf32>
    %167 = arith.negf %166 : vector<8x32xf32>
    %168 = math.exp %167 : vector<8x32xf32>
    %cst_32 = arith.constant 1.000000e+00 : f32
    %169 = vector.broadcast %cst_32 : f32 to vector<8x32xf32>
    %170 = arith.addf %169, %168 : vector<8x32xf32>
    %171 = arith.divf %169, %170 : vector<8x32xf32>
    %172 = arith.mulf %163, %146 : vector<8x32xf32>
    %173 = arith.mulf %157, %165 : vector<8x32xf32>
    %174 = arith.addf %172, %173 : vector<8x32xf32>
    %175 = math.tanh %174 : vector<8x32xf32>
    %176 = arith.mulf %171, %175 : vector<8x32xf32>
    %177 = vector.extract_strided_slice %6 {offsets = [48, 0], sizes = [8, 128], strides = [1, 1]} : vector<64x128xf32> to vector<8x128xf32>
    %cst_33 = arith.constant dense<0.000000e+00> : vector<8x128xf32>
    %178 = tpu.matmul %176, %0, %cst_33 {dimension_numbers = #tpu.dot_dimension_numbers<[1], [0], [0], [1], [0, 0, 1, 1], [], []>} : vector<8x32xf32>, vector<32x128xf32>, vector<8x128xf32> -> vector<8x128xf32>
    %179 = arith.addf %177, %178 : vector<8x128xf32>
    %180 = vector.extract_strided_slice %179 {offsets = [0, 0], sizes = [8, 32], strides = [1, 1]} : vector<8x128xf32> to vector<8x32xf32>
    %181 = arith.negf %180 : vector<8x32xf32>
    %182 = math.exp %181 : vector<8x32xf32>
    %cst_34 = arith.constant 1.000000e+00 : f32
    %183 = vector.broadcast %cst_34 : f32 to vector<8x32xf32>
    %184 = arith.addf %183, %182 : vector<8x32xf32>
    %185 = arith.divf %183, %184 : vector<8x32xf32>
    %186 = vector.extract_strided_slice %179 {offsets = [0, 32], sizes = [8, 32], strides = [1, 1]} : vector<8x128xf32> to vector<8x32xf32>
    %187 = arith.negf %186 : vector<8x32xf32>
    %188 = math.exp %187 : vector<8x32xf32>
    %cst_35 = arith.constant 1.000000e+00 : f32
    %189 = vector.broadcast %cst_35 : f32 to vector<8x32xf32>
    %190 = arith.addf %189, %188 : vector<8x32xf32>
    %191 = arith.divf %189, %190 : vector<8x32xf32>
    %192 = vector.extract_strided_slice %179 {offsets = [0, 64], sizes = [8, 32], strides = [1, 1]} : vector<8x128xf32> to vector<8x32xf32>
    %193 = math.tanh %192 : vector<8x32xf32>
    %194 = vector.extract_strided_slice %179 {offsets = [0, 96], sizes = [8, 32], strides = [1, 1]} : vector<8x128xf32> to vector<8x32xf32>
    %195 = arith.negf %194 : vector<8x32xf32>
    %196 = math.exp %195 : vector<8x32xf32>
    %cst_36 = arith.constant 1.000000e+00 : f32
    %197 = vector.broadcast %cst_36 : f32 to vector<8x32xf32>
    %198 = arith.addf %197, %196 : vector<8x32xf32>
    %199 = arith.divf %197, %198 : vector<8x32xf32>
    %200 = arith.mulf %191, %174 : vector<8x32xf32>
    %201 = arith.mulf %185, %193 : vector<8x32xf32>
    %202 = arith.addf %200, %201 : vector<8x32xf32>
    %203 = math.tanh %202 : vector<8x32xf32>
    %204 = arith.mulf %199, %203 : vector<8x32xf32>
    %205 = vector.extract_strided_slice %6 {offsets = [56, 0], sizes = [8, 128], strides = [1, 1]} : vector<64x128xf32> to vector<8x128xf32>
    %cst_37 = arith.constant dense<0.000000e+00> : vector<8x128xf32>
    %206 = tpu.matmul %204, %0, %cst_37 {dimension_numbers = #tpu.dot_dimension_numbers<[1], [0], [0], [1], [0, 0, 1, 1], [], []>} : vector<8x32xf32>, vector<32x128xf32>, vector<8x128xf32> -> vector<8x128xf32>
    %207 = arith.addf %205, %206 : vector<8x128xf32>
    %208 = vector.extract_strided_slice %207 {offsets = [0, 0], sizes = [8, 32], strides = [1, 1]} : vector<8x128xf32> to vector<8x32xf32>
    %209 = arith.negf %208 : vector<8x32xf32>
    %210 = math.exp %209 : vector<8x32xf32>
    %cst_38 = arith.constant 1.000000e+00 : f32
    %211 = vector.broadcast %cst_38 : f32 to vector<8x32xf32>
    %212 = arith.addf %211, %210 : vector<8x32xf32>
    %213 = arith.divf %211, %212 : vector<8x32xf32>
    %214 = vector.extract_strided_slice %207 {offsets = [0, 32], sizes = [8, 32], strides = [1, 1]} : vector<8x128xf32> to vector<8x32xf32>
    %215 = arith.negf %214 : vector<8x32xf32>
    %216 = math.exp %215 : vector<8x32xf32>
    %cst_39 = arith.constant 1.000000e+00 : f32
    %217 = vector.broadcast %cst_39 : f32 to vector<8x32xf32>
    %218 = arith.addf %217, %216 : vector<8x32xf32>
    %219 = arith.divf %217, %218 : vector<8x32xf32>
    %220 = vector.extract_strided_slice %207 {offsets = [0, 64], sizes = [8, 32], strides = [1, 1]} : vector<8x128xf32> to vector<8x32xf32>
    %221 = math.tanh %220 : vector<8x32xf32>
    %222 = vector.extract_strided_slice %207 {offsets = [0, 96], sizes = [8, 32], strides = [1, 1]} : vector<8x128xf32> to vector<8x32xf32>
    %223 = arith.negf %222 : vector<8x32xf32>
    %224 = math.exp %223 : vector<8x32xf32>
    %cst_40 = arith.constant 1.000000e+00 : f32
    %225 = vector.broadcast %cst_40 : f32 to vector<8x32xf32>
    %226 = arith.addf %225, %224 : vector<8x32xf32>
    %227 = arith.divf %225, %226 : vector<8x32xf32>
    %228 = arith.mulf %219, %202 : vector<8x32xf32>
    %229 = arith.mulf %213, %221 : vector<8x32xf32>
    %230 = arith.addf %228, %229 : vector<8x32xf32>
    %231 = math.tanh %230 : vector<8x32xf32>
    %232 = arith.mulf %227, %231 : vector<8x32xf32>
    %c0_41 = arith.constant 0 : index
    %c0_42 = arith.constant 0 : index
    %233 = vector.load %arg5[%c0_41, %c0_42] : memref<8x32xf32, #tpu.memory_space<vmem>>, vector<8x32xf32>
    tpu.vector_store %arg5[%c0_41, %c0_42], %232 {strides = array<i32>} : memref<8x32xf32, #tpu.memory_space<vmem>>, vector<8x32xf32>,
    return
  }
  func.func @transform_0(%arg0: i32) -> (i32, i32) {
    %c0_i32 = arith.constant 0 : i32
    %c0_i32_0 = arith.constant 0 : i32
    %c0_i32_1 = arith.constant 0 : i32
    return %c0_i32, %c0_i32_0 : i32, i32
  }
  func.func @transform_1(%arg0: i32) -> (i32, i32) {
    %c0_i32 = arith.constant 0 : i32
    %c0_i32_0 = arith.constant 0 : i32
    %c0_i32_1 = arith.constant 0 : i32
    return %c0_i32, %c0_i32_0 : i32, i32
  }
  func.func @transform_2(%arg0: i32) -> (i32, i32) {
    %c0_i32 = arith.constant 0 : i32
    %c0_i32_0 = arith.constant 0 : i32
    %c0_i32_1 = arith.constant 0 : i32
    return %c0_i32, %c0_i32_0 : i32, i32
  }
  func.func @transform_3(%arg0: i32) -> (i32, i32) {
    %c0_i32 = arith.constant 0 : i32
    %c0_i32_0 = arith.constant 0 : i32
    %c0_i32_1 = arith.constant 0 : i32
    return %c0_i32, %c0_i32_0 : i32, i32
  }
  func.func @transform_4(%arg0: i32) -> (i32, i32) {
    %c0_i32 = arith.constant 0 : i32
    %c0_i32_0 = arith.constant 0 : i32
    %c0_i32_1 = arith.constant 0 : i32
    return %c0_i32, %c0_i32_0 : i32, i32
  }
}

</mosaic_0001>

<bundles_post_ra>
// kernel: tpu_custom_call.1
= control target key start
LH: loop header
LB: loop body
LE: loop exit
PB: predicated region body
PF: predicated region fallthrough
CT: control target
= control target key end

     0   :  { %v1256_v3 = vmov 0.0   ;;  %vm39_vm0 = vcmask 130048   ;;  %s1493_s0 = inlined_call_operand.vmem [shape: f32[64,16], index: 0, kind: input, shape index: {}]   ;;  %s1494_s1 = inlined_call_operand.vmem [shape: f32[16,128], index: 1, kind: input, shape index: {}]   ;;  %s1495_s2 = inlined_call_operand.vmem [shape: f32[32,128], index: 2, kind: input, shape index: {}]   ;;  %s1496_s3 = inlined_call_operand.vmem [shape: f32[1,128], index: 3, kind: input, shape index: {}]   ;;  %s1497_s4 = inlined_call_operand.hbm [shape: f32[8,32], index: 4, kind: output, shape index: {}]  }
   0x1   :  { %v32_v0 = vld [vmem:[%s1494_s1 + $0x8] sm:$0xff]  ;;  %v1292_v1 = vld [vmem:[%s1495_s2 + $0x18] sm:$0xff]  ;;  %v31_v2 = vld [vmem:[%s1494_s1] sm:$0xff]  ;;  %1077 = vmatprep.subr.mxu1 %v1256_v3 }
   0x2   :  { %1061 = vmatprep.subr.mxu0 %v32_v0  ;;  %v23_v4 = vld [vmem:[%s1493_s0] sm:$0xff]  ;;  %1078 = vmatpush3.msra.mxu1 %v1292_v1  ;;  %v1305_v5 = vld [vmem:[%s1495_s2 + $0x10] sm:$0xff]  ;;  %v24_v6 = vld [vmem:[%s1493_s0 + $0x8] sm:$0xff] }
   0x3   :  { %1062 = vmatpush3.msra.mxu0 %v32_v0 }
   0x4   :  { %9 = vsyncpa [#allocation3], 0  ;;  %1063 = vmatprep.subr.mxu0 %v31_v2  ;;  %1079 = vmatprep.subr.mxu1 %v1256_v3  ;;  %v1315_v7 = vld [vmem:[%s1495_s2 + $0x8] sm:$0xff]  ;;  %v1323_v8 = vld [vmem:[%s1495_s2] sm:$0xff]  ;;  %vm1257_vm1 = vmmov 0   ;;  %s1258_s5 = smov 64  }
   0x5   :  { %1064 = vmatpush3.msra.mxu0 %v31_v2  ;;  %1065 = vmatprep.mubr.msk.f32.mxu0 %vm39_vm0, %v23_v4  ;;  %v1354_v10 = vld [vmem:[%s1496_s3] ss:$0 sm:$0xff]  ;;  %s1259_s3 = smov 32   ;;  %vm169_vm2 = vcmask 261120   ;;  %v25_v44 = vld [vmem:[%s1493_s0 + $0x10] sm:$0xff]  ;;  %v26_v45 = vld [vmem:[%s1493_s0 + $0x18] sm:$0xff] }
   0x6   :  { %1080 = vmatpush3.msra.mxu1 %v1305_v5  ;;  %1066 = vmatmul.mubr.msk.f32.vlgmr.msra.gmra.mxu0 %vm39_vm0, %v24_v6  ;;  %v27_v46 = vld [vmem:[%s1493_s0 + $0x20] sm:$0xff]  ;;  %v28_v47 = vld [vmem:[%s1493_s0 + $0x28] sm:$0xff]  ;;  %v29_v48 = vld [vmem:[%s1493_s0 + $0x30] sm:$0xff] }
   0x7   :  { %1081 = vmatprep.subr.mxu1 %v1256_v3  ;;  %1085 = vmatprep.mubr.msk.f32.mxu1 %vm1257_vm1, %v1256_v3  ;;  %v30_v49 = vld [vmem:[%s1493_s0 + $0x38] sm:$0xff]  ;;  %s1260_s0 = smov [#allocation2]  }
   0x8   :  { %1082 = vmatpush3.msra.mxu1 %v1315_v7  ;;  %1099 = vmatprep.subr.mxu0 %v1256_v3  ;;  %s979_s18 = sshll.u32 %s1260_s0, 4  ;;  %s980_s18 = int_to_ptr.vmem [resolvable:$true] %s979_s18 }
   0x9   :  { %1083 = vmatprep.subr.mxu1 %v1256_v3  ;;  %1100 = vmatpush3.msra.mxu0 %v1292_v1  ;;  %s1234_s19 = scalar_lea.vmem %s980_s18, 128  ;;  %p1239_p1 = scmp.lt.s32.totalorder %s980_s18, %s980_s18 }
   0xa   :  { %1084 = vmatpush3.msra.mxu1 %v1323_v8  ;;  %1101 = vmatprep.subr.mxu0 %v1256_v3  ;;  %p1235_p0 = scmp.ne.s32.totalorder %s980_s18, %s1234_s19  ;;  %p1240_p2 = scmp.lt.s32.totalorder %s1234_s19, %s1234_s19 }
   0xb   :  { %1086 = vmatmul.mubr.f32.vlgmr.msra.gmra.mxu1 %v1256_v3  ;;  %1088 = vmatprep.subr.mxu1 %v1256_v3 }
   0xc   :  { %1089 = vmatpush3.msra.mxu1 %v1292_v1  ;;  %1096 = vmatprep.mubr.msk.f32.mxu1 %vm1257_vm1, %v1256_v3  ;;  %p1241_p3 = por %p1240_p2, %p1239_p1 }
   0xd   :  { %1090 = vmatprep.subr.mxu1 %v1256_v3  ;;  %1102 = vmatpush3.msra.mxu0 %v1305_v5 }
   0xe   :  { %1091 = vmatpush3.msra.mxu1 %v1305_v5  ;;  %1103 = vmatprep.subr.mxu0 %v1256_v3  ;;  %p1242_p4 = pnand %p1241_p3, %p1235_p0 }
   0xf   :  { %1092 = vmatprep.subr.mxu1 %v1256_v3  ;;  %1104 = vmatpush3.msra.mxu0 %v1315_v7 }
  0x10   :  { %1093 = vmatpush3.msra.mxu1 %v1315_v7  ;;  %1105 = vmatprep.subr.mxu0 %v1256_v3 }
  0x11   :  { %1094 = vmatprep.subr.mxu1 %v1256_v3  ;;  %1106 = vmatpush3.msra.mxu0 %v1323_v8 }
  0x12   :  { %1095 = vmatpush3.msra.mxu1 %v1323_v8  ;;  %1121 = vmatprep.subr.mxu0 %v1256_v3 }
  0x13   :  { %1110 = vmatprep.subr.mxu1 %v1256_v3  ;;  %1068 = vmatprep.mubr.msk.f32.mxu0 %vm39_vm0, %v25_v44 }
  0x14   :  { %1069 = vmatmul.mubr.msk.f32.gmra.mxu0 %vm39_vm0, %v26_v45 }
  0x15   :  { %1071 = vmatprep.mubr.msk.f32.mxu0 %vm39_vm0, %v27_v46 }
  0x18   :  { %1072 = vmatmul.mubr.msk.f32.gmra.mxu0 %vm39_vm0, %v28_v47 }
  0x19   :  { %1074 = vmatprep.mubr.msk.f32.mxu0 %vm39_vm0, %v29_v48 }
  0x1c   :  { %1075 = vmatmul.mubr.msk.f32.gmra.mxu0 %vm39_vm0, %v30_v49 }
  0x1d   :  { %1107 = vmatprep.mubr.msk.f32.mxu0 %vm1257_vm1, %v1256_v3 }
  0xc6   :  { %v1067_v9 = vpop.f32.mrf.mxu0 }
  0xc7   :  { %v136_v30 = vadd.f32 %v1067_v9, %v1354_v10 }
  0xc8   :  { %v130_v11 = vpop.f32.mrf.mxu0 }
  0xc9   :  { %v131_v12 = vadd.f32 %v1354_v10, %v130_v11 }
  0xcb   :  { %v239_v13 = vpop.f32.mrf.mxu1 }
  0xcc   :  { %v243_v14 = vadd.f32 %v239_v13, %v131_v12 }
  0xcd   :  { %v1087_v15 = vpop.f32.mrf.mxu1 }
  0xce   :  { %1170 = vtanh.f32 %v243_v14  ;;  %v996_v17 = vmul.f32 -1.442695, %v243_v14 }
  0xd0   :  { %1172 = vpow2.f32 %v996_v17 }
  0xd4   :  { %v1070_v54 = vpop.f32.mrf.mxu0 }
  0xd6   :  { %v140_v55 = vpop.f32.mrf.mxu0 }
  0xd7   :  { %v141_v60 = vadd.f32 %v1354_v10, %v140_v55 }
  0xd8   :  { %v1414_v56 = vpop.f32.mrf.mxu0 }
  0xda   :  { %v1416_v57 = vpop.f32.mrf.mxu0 }
  0xdb   :  { %v1171_v16 = vpop.eup %1170 }
  0xdc   :  { %253 = vrot.lane.b32.xlu0 %v1171_v16, %s1258_s5  ;;  %v1418_v58 = vpop.f32.mrf.mxu0 }
  0xdd   :  { %v1173_v18 = vpop.eup %1172 }
  0xde   :  { %v247_v19 = vadd.f32 1.0, %v1173_v18  ;;  %v1420_v59 = vpop.f32.mrf.mxu0 }
  0xe0   :  { %1174 = vrcp.f32 %v247_v19 }
  0xed   :  { %v1175_v20 = vpop.eup %1174 }
  0xee   :  { %v251_v23 = vmul.f32 0.0, %v1175_v20 }
 0x14e   :  { %v254_v21 = vpop.permute.xlu0 %253 }
 0x14f   :  { %v256_v22 = vmul.f32 %v1175_v20, %v254_v21 }
 0x151   :  { %258 = vrot.lane.b32.xlu0 %v256_v22, %s1259_s3 }
 0x1c3   :  { %v259_v24 = vpop.permute.xlu0 %258 }
 0x1c4   :  { %v261_v25 = vadd.f32 %v259_v24, %v251_v23 }
 0x1c6   :  { %1176 = vtanh.f32 %v261_v25 }
 0x1d3   :  { %v1177_v26 = vpop.eup %1176 }
 0x1d4   :  { %264 = vrot.lane.b32.xlu1 %v1177_v26, %s1258_s5 }
 0x246   :  { %v265_v27 = vpop.permute.xlu1 %264 }
 0x247   :  { %v267_v28 = vmul.f32 %v1175_v20, %v265_v27  ;;  %v146_v20 = vadd.f32 %v1070_v54, %v1354_v10 }
 0x249   :  { %269 = vrot.lane.b32.xlu1 %v267_v28, %s1259_s3 }
 0x2bb   :  { %v270_v29 = vpop.permute.xlu1 %269 }
 0x2bc   :  { %1097 = vmatmul.mubr.msk.f32.vlgmr.msra.gmra.mxu1 %vm169_vm2, %v270_v29 }
 0x2bd   :  { %1111 = vmatpush3.msra.mxu1 %v1292_v1  ;;  %1118 = vmatprep.mubr.msk.f32.mxu1 %vm1257_vm1, %v1256_v3 }
 0x2be   :  { %1112 = vmatprep.subr.mxu1 %v1256_v3 }
 0x2bf   :  { %1113 = vmatpush3.msra.mxu1 %v1305_v5 }
 0x2c0   :  { %1114 = vmatprep.subr.mxu1 %v1256_v3 }
 0x2c1   :  { %1115 = vmatpush3.msra.mxu1 %v1315_v7 }
 0x2c2   :  { %1116 = vmatprep.subr.mxu1 %v1256_v3 }
 0x2c3   :  { %1117 = vmatpush3.msra.mxu1 %v1323_v8 }
 0x2c4   :  { %1132 = vmatprep.subr.mxu1 %v1256_v3 }
 0x37c   :  { %v339_v31 = vpop.f32.mrf.mxu1 }
 0x37d   :  { %v343_v32 = vadd.f32 %v339_v31, %v136_v30 }
 0x37e   :  { %v1098_v33 = vpop.f32.mrf.mxu1 }
 0x37f   :  { %1178 = vtanh.f32 %v343_v32  ;;  %v998_v35 = vmul.f32 -1.442695, %v343_v32 }
 0x381   :  { %1180 = vpow2.f32 %v998_v35 }
 0x38c   :  { %v1179_v34 = vpop.eup %1178 }
 0x38d   :  { %353 = vrot.lane.b32.xlu0 %v1179_v34, %s1258_s5 }
 0x38e   :  { %v1181_v36 = vpop.eup %1180 }
 0x38f   :  { %v347_v37 = vadd.f32 1.0, %v1181_v36 }
 0x391   :  { %1182 = vrcp.f32 %v347_v37 }
 0x39e   :  { %v1183_v38 = vpop.eup %1182 }
 0x39f   :  { %v351_v41 = vmul.f32 %v1183_v38, %v261_v25 }
 0x3ff   :  { %v354_v39 = vpop.permute.xlu0 %353 }
 0x400   :  { %v356_v40 = vmul.f32 %v1183_v38, %v354_v39 }
 0x402   :  { %358 = vrot.lane.b32.xlu1 %v356_v40, %s1259_s3 }
 0x474   :  { %v359_v42 = vpop.permute.xlu1 %358 }
 0x475   :  { %v361_v43 = vadd.f32 %v359_v42, %v351_v41 }
 0x477   :  { %1184 = vtanh.f32 %v361_v43 }
 0x484   :  { %v1185_v50 = vpop.eup %1184 }
 0x485   :  { %364 = vrot.lane.b32.xlu0 %v1185_v50, %s1258_s5 }
 0x4f7   :  { %v365_v51 = vpop.permute.xlu0 %364 }
 0x4f8   :  { %v367_v52 = vmul.f32 %v1183_v38, %v365_v51  ;;  %v151_v38 = vadd.f32 %v1354_v10, %v1416_v57  ;;  %v156_v57 = vadd.f32 %v1414_v56, %v1354_v10 }
 0x4fa   :  { %369 = vrot.lane.b32.xlu1 %v367_v52, %s1259_s3 }
 0x56c   :  { %v370_v53 = vpop.permute.xlu1 %369 }
 0x56d   :  { %1108 = vmatmul.mubr.msk.f32.vlgmr.msra.gmra.mxu0 %vm169_vm2, %v370_v53 }
 0x56e   :  { %1122 = vmatpush3.msra.mxu0 %v1292_v1  ;;  %1129 = vmatprep.mubr.msk.f32.mxu0 %vm1257_vm1, %v1256_v3 }
 0x56f   :  { %1123 = vmatprep.subr.mxu0 %v1256_v3 }
 0x570   :  { %1124 = vmatpush3.msra.mxu0 %v1305_v5 }
 0x571   :  { %1125 = vmatprep.subr.mxu0 %v1256_v3 }
 0x572   :  { %1126 = vmatpush3.msra.mxu0 %v1315_v7 }
 0x573   :  { %1127 = vmatprep.subr.mxu0 %v1256_v3 }
 0x574   :  { %1128 = vmatpush3.msra.mxu0 %v1323_v8 }
 0x575   :  { %1143 = vmatprep.subr.mxu0 %v1256_v3 }
 0x62d   :  { %v439_v61 = vpop.f32.mrf.mxu0 }
 0x62e   :  { %v443_v62 = vadd.f32 %v439_v61, %v141_v60 }
 0x62f   :  { %v1109_v63 = vpop.f32.mrf.mxu0 }
 0x630   :  { %1186 = vtanh.f32 %v443_v62  ;;  %v1000_v2 = vmul.f32 -1.442695, %v443_v62 }
 0x632   :  { %1188 = vpow2.f32 %v1000_v2 }
 0x63d   :  { %v1187_v0 = vpop.eup %1186 }
 0x63e   :  { %453 = vrot.lane.b32.xlu0 %v1187_v0, %s1258_s5 }
 0x63f   :  { %v1189_v4 = vpop.eup %1188 }
 0x640   :  { %v447_v6 = vadd.f32 1.0, %v1189_v4 }
 0x642   :  { %1190 = vrcp.f32 %v447_v6 }
 0x64f   :  { %v1191_v9 = vpop.eup %1190 }
 0x650   :  { %v451_v13 = vmul.f32 %v1191_v9, %v361_v43 }
 0x6b0   :  { %v454_v11 = vpop.permute.xlu0 %453 }
 0x6b1   :  { %v456_v12 = vmul.f32 %v1191_v9, %v454_v11 }
 0x6b3   :  { %458 = vrot.lane.b32.xlu1 %v456_v12, %s1259_s3 }
 0x725   :  { %v459_v14 = vpop.permute.xlu1 %458 }
 0x726   :  { %v461_v15 = vadd.f32 %v459_v14, %v451_v13  ;;  %v161_v13 = vadd.f32 %v1354_v10, %v1420_v59 }
 0x728   :  { %1192 = vtanh.f32 %v461_v15 }
 0x735   :  { %v1193_v16 = vpop.eup %1192 }
 0x736   :  { %464 = vrot.lane.b32.xlu0 %v1193_v16, %s1258_s5 }
 0x7a8   :  { %v465_v17 = vpop.permute.xlu0 %464 }
 0x7a9   :  { %v467_v18 = vmul.f32 %v1191_v9, %v465_v17 }
 0x7ab   :  { %469 = vrot.lane.b32.xlu1 %v467_v18, %s1259_s3 }
 0x81d   :  { %v470_v19 = vpop.permute.xlu1 %469 }
 0x81e   :  { %1119 = vmatmul.mubr.msk.f32.vlgmr.msra.gmra.mxu1 %vm169_vm2, %v470_v19 }
 0x81f   :  { %1133 = vmatpush3.msra.mxu1 %v1292_v1  ;;  %1140 = vmatprep.mubr.msk.f32.mxu1 %vm1257_vm1, %v1256_v3 }
 0x820   :  { %1134 = vmatprep.subr.mxu1 %v1256_v3 }
 0x821   :  { %1135 = vmatpush3.msra.mxu1 %v1305_v5 }
 0x822   :  { %1136 = vmatprep.subr.mxu1 %v1256_v3 }
 0x823   :  { %1137 = vmatpush3.msra.mxu1 %v1315_v7 }
 0x824   :  { %1138 = vmatprep.subr.mxu1 %v1256_v3 }
 0x825   :  { %1139 = vmatpush3.msra.mxu1 %v1323_v8 }
 0x826   :  { %1154 = vmatprep.subr.mxu1 %v1256_v3 }
 0x8de   :  { %v539_v21 = vpop.f32.mrf.mxu1 }
 0x8df   :  { %v543_v22 = vadd.f32 %v539_v21, %v146_v20 }
 0x8e0   :  { %v1120_v23 = vpop.f32.mrf.mxu1 }
 0x8e1   :  { %1194 = vtanh.f32 %v543_v22  ;;  %v1002_v25 = vmul.f32 -1.442695, %v543_v22 }
 0x8e3   :  { %1196 = vpow2.f32 %v1002_v25 }
 0x8ee   :  { %v1195_v24 = vpop.eup %1194 }
 0x8ef   :  { %553 = vrot.lane.b32.xlu0 %v1195_v24, %s1258_s5 }
 0x8f0   :  { %v1197_v26 = vpop.eup %1196 }
 0x8f1   :  { %v547_v27 = vadd.f32 1.0, %v1197_v26 }
 0x8f3   :  { %1198 = vrcp.f32 %v547_v27 }
 0x900   :  { %v1199_v28 = vpop.eup %1198 }
 0x901   :  { %v551_v31 = vmul.f32 %v1199_v28, %v461_v15 }
 0x961   :  { %v554_v29 = vpop.permute.xlu0 %553 }
 0x962   :  { %v556_v30 = vmul.f32 %v1199_v28, %v554_v29 }
 0x964   :  { %558 = vrot.lane.b32.xlu1 %v556_v30, %s1259_s3  ;;  %v166_v30 = vadd.f32 %v1418_v58, %v1354_v10 }
 0x9d6   :  { %v559_v32 = vpop.permute.xlu1 %558 }
 0x9d7   :  { %v561_v33 = vadd.f32 %v559_v32, %v551_v31 }
 0x9d9   :  { %1200 = vtanh.f32 %v561_v33 }
 0x9e6   :  { %v1201_v34 = vpop.eup %1200 }
 0x9e7   :  { %564 = vrot.lane.b32.xlu0 %v1201_v34, %s1258_s5 }
 0xa59   :  { %v565_v35 = vpop.permute.xlu0 %564 }
 0xa5a   :  { %v567_v36 = vmul.f32 %v1199_v28, %v565_v35 }
 0xa5c   :  { %569 = vrot.lane.b32.xlu1 %v567_v36, %s1259_s3 }
 0xace   :  { %v570_v37 = vpop.permute.xlu1 %569 }
 0xacf   :  { %1130 = vmatmul.mubr.msk.f32.vlgmr.msra.gmra.mxu0 %vm169_vm2, %v570_v37 }
 0xad0   :  { %1144 = vmatpush3.msra.mxu0 %v1292_v1  ;;  %1151 = vmatprep.mubr.msk.f32.mxu0 %vm1257_vm1, %v1256_v3 }
 0xad1   :  { %1145 = vmatprep.subr.mxu0 %v1256_v3 }
 0xad2   :  { %1146 = vmatpush3.msra.mxu0 %v1305_v5 }
 0xad3   :  { %1147 = vmatprep.subr.mxu0 %v1256_v3 }
 0xad4   :  { %1148 = vmatpush3.msra.mxu0 %v1315_v7 }
 0xad5   :  { %1149 = vmatprep.subr.mxu0 %v1256_v3 }
 0xad6   :  { %1150 = vmatpush3.msra.mxu0 %v1323_v8 }
 0xb8f   :  { %v639_v39 = vpop.f32.mrf.mxu0 }
 0xb90   :  { %v643_v40 = vadd.f32 %v639_v39, %v151_v38 }
 0xb91   :  { %v1131_v41 = vpop.f32.mrf.mxu0 }
 0xb92   :  { %1202 = vtanh.f32 %v643_v40  ;;  %v1004_v43 = vmul.f32 -1.442695, %v643_v40 }
 0xb94   :  { %1204 = vpow2.f32 %v1004_v43 }
 0xb9f   :  { %v1203_v42 = vpop.eup %1202 }
 0xba0   :  { %653 = vrot.lane.b32.xlu0 %v1203_v42, %s1258_s5 }
 0xba1   :  { %v1205_v44 = vpop.eup %1204 }
 0xba2   :  { %v647_v45 = vadd.f32 1.0, %v1205_v44 }
 0xba4   :  { %1206 = vrcp.f32 %v647_v45 }
 0xbb1   :  { %v1207_v46 = vpop.eup %1206 }
 0xbb2   :  { %v651_v49 = vmul.f32 %v1207_v46, %v561_v33 }
 0xc12   :  { %v654_v47 = vpop.permute.xlu0 %653 }
 0xc13   :  { %v656_v48 = vmul.f32 %v1207_v46, %v654_v47 }
 0xc15   :  { %658 = vrot.lane.b32.xlu1 %v656_v48, %s1259_s3 }
 0xc87   :  { %v659_v50 = vpop.permute.xlu1 %658 }
 0xc88   :  { %v661_v51 = vadd.f32 %v659_v50, %v651_v49 }
 0xc8a   :  { %1208 = vtanh.f32 %v661_v51 }
 0xc97   :  { %v1209_v52 = vpop.eup %1208 }
 0xc98   :  { %664 = vrot.lane.b32.xlu0 %v1209_v52, %s1258_s5 }
 0xd0a   :  { %v665_v53 = vpop.permute.xlu0 %664 }
 0xd0b   :  { %v667_v54 = vmul.f32 %v1207_v46, %v665_v53 }
 0xd0d   :  { %669 = vrot.lane.b32.xlu1 %v667_v54, %s1259_s3 }
 0xd7f   :  { %v670_v55 = vpop.permute.xlu1 %669 }
 0xd80   :  { %1141 = vmatmul.mubr.msk.f32.vlgmr.msra.gmra.mxu1 %vm169_vm2, %v670_v55 }
 0xd81   :  { %1155 = vmatpush3.msra.mxu1 %v1292_v1  ;;  %1162 = vmatprep.mubr.msk.f32.mxu1 %vm1257_vm1, %v1256_v3 }
 0xd82   :  { %1156 = vmatprep.subr.mxu1 %v1256_v3 }
 0xd83   :  { %1157 = vmatpush3.msra.mxu1 %v1305_v5 }
 0xd84   :  { %1158 = vmatprep.subr.mxu1 %v1256_v3 }
 0xd85   :  { %1159 = vmatpush3.msra.mxu1 %v1315_v7 }
 0xd86   :  { %1160 = vmatprep.subr.mxu1 %v1256_v3 }
 0xd87   :  { %1161 = vmatpush3.msra.mxu1 %v1323_v8 }
 0xe40   :  { %v739_v60 = vpop.f32.mrf.mxu1 }
 0xe41   :  { %v743_v1 = vadd.f32 %v739_v60, %v156_v57 }
 0xe42   :  { %v1142_v61 = vpop.f32.mrf.mxu1 }
 0xe43   :  { %1210 = vtanh.f32 %v743_v1  ;;  %v1006_v63 = vmul.f32 -1.442695, %v743_v1 }
 0xe45   :  { %1212 = vpow2.f32 %v1006_v63 }
 0xe50   :  { %v1211_v62 = vpop.eup %1210 }
 0xe51   :  { %753 = vrot.lane.b32.xlu0 %v1211_v62, %s1258_s5 }
 0xe52   :  { %v1213_v5 = vpop.eup %1212 }
 0xe53   :  { %v747_v0 = vadd.f32 1.0, %v1213_v5 }
 0xe55   :  { %1214 = vrcp.f32 %v747_v0 }
 0xe62   :  { %v1215_v7 = vpop.eup %1214 }
 0xe63   :  { %v751_v8 = vmul.f32 %v1215_v7, %v661_v51 }
 0xec3   :  { %v754_v2 = vpop.permute.xlu0 %753 }
 0xec4   :  { %v756_v3 = vmul.f32 %v1215_v7, %v754_v2 }
 0xec6   :  { %758 = vrot.lane.b32.xlu1 %v756_v3, %s1259_s3 }
 0xf38   :  { %v759_v4 = vpop.permute.xlu1 %758 }
 0xf39   :  { %v761_v56 = vadd.f32 %v759_v4, %v751_v8 }
 0xf3b   :  { %1216 = vtanh.f32 %v761_v56 }
 0xf48   :  { %v1217_v6 = vpop.eup %1216 }
 0xf49   :  { %764 = vrot.lane.b32.xlu0 %v1217_v6, %s1258_s5 }
 0xfbb   :  { %v765_v9 = vpop.permute.xlu0 %764 }
 0xfbc   :  { %v767_v11 = vmul.f32 %v1215_v7, %v765_v9 }
 0xfbe   :  { %769 = vrot.lane.b32.xlu1 %v767_v11, %s1259_s3 }
0x1030   :  { %v770_v12 = vpop.permute.xlu1 %769 }
0x1031   :  { %1152 = vmatmul.mubr.msk.f32.vlgmr.msra.gmra.mxu0 %vm169_vm2, %v770_v12 }
0x10f1   :  { %v839_v14 = vpop.f32.mrf.mxu0 }
0x10f2   :  { %v843_v15 = vadd.f32 %v839_v14, %v161_v13 }
0x10f3   :  { %v1153_v16 = vpop.f32.mrf.mxu0 }
0x10f4   :  { %1218 = vtanh.f32 %v843_v15  ;;  %v1008_v18 = vmul.f32 -1.442695, %v843_v15 }
0x10f6   :  { %1220 = vpow2.f32 %v1008_v18 }
0x1101   :  { %v1219_v17 = vpop.eup %1218 }
0x1102   :  { %853 = vrot.lane.b32.xlu0 %v1219_v17, %s1258_s5 }
0x1103   :  { %v1221_v19 = vpop.eup %1220 }
0x1104   :  { %v847_v20 = vadd.f32 1.0, %v1221_v19 }
0x1106   :  { %1222 = vrcp.f32 %v847_v20 }
0x1113   :  { %v1223_v21 = vpop.eup %1222 }
0x1114   :  { %v851_v24 = vmul.f32 %v1223_v21, %v761_v56 }
0x1174   :  { %v854_v22 = vpop.permute.xlu0 %853 }
0x1175   :  { %v856_v23 = vmul.f32 %v1223_v21, %v854_v22 }
0x1177   :  { %858 = vrot.lane.b32.xlu1 %v856_v23, %s1259_s3 }
0x11e9   :  { %v859_v25 = vpop.permute.xlu1 %858 }
0x11ea   :  { %v861_v59 = vadd.f32 %v859_v25, %v851_v24 }
0x11ec   :  { %1224 = vtanh.f32 %v861_v59 }
0x11f9   :  { %v1225_v26 = vpop.eup %1224 }
0x11fa   :  { %864 = vrot.lane.b32.xlu0 %v1225_v26, %s1258_s5 }
0x126c   :  { %v865_v27 = vpop.permute.xlu0 %864 }
0x126d   :  { %v867_v28 = vmul.f32 %v1223_v21, %v865_v27 }
0x126f   :  { %869 = vrot.lane.b32.xlu1 %v867_v28, %s1259_s3 }
0x12e1   :  { %v870_v29 = vpop.permute.xlu1 %869 }
0x12e2   :  { %1163 = vmatmul.mubr.msk.f32.vlgmr.msra.gmra.mxu1 %vm169_vm2, %v870_v29 }
0x13a2   :  { %v939_v31 = vpop.f32.mrf.mxu1 }
0x13a3   :  { %v943_v32 = vadd.f32 %v939_v31, %v166_v30 }
0x13a4   :  { %v1164_v33 = vpop.f32.mrf.mxu1 }
0x13a5   :  { %1226 = vtanh.f32 %v943_v32  ;;  %v1010_v35 = vmul.f32 -1.442695, %v943_v32 }
0x13a7   :  { %1228 = vpow2.f32 %v1010_v35 }
0x13b2   :  { %v1227_v34 = vpop.eup %1226 }
0x13b3   :  { %953 = vrot.lane.b32.xlu0 %v1227_v34, %s1258_s5 }
0x13b4   :  { %v1229_v36 = vpop.eup %1228 }
0x13b5   :  { %v947_v37 = vadd.f32 1.0, %v1229_v36 }
0x13b7   :  { %1230 = vrcp.f32 %v947_v37 }
0x13c4   :  { %v1231_v38 = vpop.eup %1230 }
0x13c5   :  { %v951_v41 = vmul.f32 %v1231_v38, %v861_v59 }
0x1425   :  { %v954_v39 = vpop.permute.xlu0 %953 }
0x1426   :  { %v956_v40 = vmul.f32 %v1231_v38, %v954_v39 }
0x1428   :  { %958 = vrot.lane.b32.xlu1 %v956_v40, %s1259_s3 }
0x149a   :  { %v959_v42 = vpop.permute.xlu1 %958 }
0x149b   :  { %v961_v10 = vadd.f32 %v959_v42, %v951_v41 }
0x149d   :  { %1232 = vtanh.f32 %v961_v10 }
0x14aa   :  { %v1233_v58 = vpop.eup %1232 }
0x14ab   :  { %964 = vrot.lane.b32.xlu0 %v1233_v58, %s1258_s5 }
0x151d   :  { %v965_v43 = vpop.permute.xlu0 %964 }
0x151e   :  { %v967_v44 = vmul.f32 %v1231_v38, %v965_v43 }
0x1520   :  { %969 = vrot.lane.b32.xlu1 %v967_v44, %s1259_s3 }
0x1592   :  { %v970_v45 = vpop.permute.xlu1 %969 }
0x1593   :  { %972 = vst.msk [vmem:[#allocation2] sm:$0xff] %vm169_vm2, %v970_v45 }
0x1594   :  { %1245 = shalt.err (!%p1242_p4)
}
0x1595   :  { %982 = dma.vmem_to_hbm [thread:$0]  %s980_s18, 128, %s1497_s4, [#allocation3]  }
0x1596   :  { %1254 = dma.done.wait [#allocation3], 128  }
0x1597   :  { %1255 = vsyncadd [#allocation3], 4294967168 }
0x1598   :  { %986 = vsyncpa [#allocation3], 1 }

</bundles_post_ra>
